<compile_context>
chip_gen: v7x
topology: tpu7x:2x2x1
jax: 0.10.0
libtpu: 0.0.40
codegen_flags: <defaults>
</compile_context>

<pallas_src>
import functools

import jax
import jax.numpy as jnp
from jax import lax
from jax.experimental import pallas as pl
from jax.experimental.pallas import tpu as pltpu


def _round_up(n, m):
    return (n + m - 1) // m * m


def _fused_mbconv_kernel(x_ref, w1_ref, w2_ref, b2_ref, mask_ref, o_ref,
                         *, H, W, C, C_pad):
    # x_ref:    (B, C, H*W)          f32 input (residual read from the same block)
    # w1_ref:   (Cmid_pad, 9*C_pad)  bf16 3x3 weights, tap-major / channel-minor,
    #                                b1 folded into the center-tap "ones" column
    # w2_ref:   (C, Cmid_pad)        bf16 1x1 weights
    # b2_ref:   (C, 1)               f32
    # mask_ref: (9, B*H*W)           f32 0/1 'same'-padding validity per tap
    # o_ref:    (B, C, H*W)
    B = x_ref.shape[0]
    HW = H * W
    N = B * HW

    # Fold batch onto the lane axis (aligned 128-lane concat, no transpose, no extra DMA).
    x32 = jnp.concatenate([x_ref[b] for b in range(B)],
                          axis=1).astype(jnp.float32)            # (C, N)

    # Channel-pad to a sublane multiple; the LAST padded row is all ones and carries
    # the conv_input bias through the center tap of w1 (exact fold, zero extra work).
    parts = [x32]
    if C_pad - C - 1 > 0:
        parts.append(jnp.zeros((C_pad - C - 1, N), jnp.float32))
    parts.append(jnp.ones((1, N), jnp.float32))
    x_p = jnp.concatenate(parts, axis=0)                          # (C_pad, N)

    # im2col: one XLU lane-roll + one VPU multiply per non-center tap.  The masks are
    # functions of (lane mod HW), which also zeroes cross-image bleed of the roll.
    cols = []
    t = 0
    for ky in range(3):
        for kx in range(3):
            off = (ky - 1) * W + (kx - 1)
            if off == 0:
                cols.append(x_p)                                  # center tap, never masked
            else:
                rolled = pltpu.roll(x_p, shift=(-off) % N, axis=1)
                cols.append(rolled * mask_ref[pl.ds(t, 1), :])
            t += 1
    # NOTE: for production spatial tiles, stage im2col into a VMEM scratch
    # (scratch_shapes=[pltpu.VMEM(...)]) instead of a value-level concat.
    im2col = jnp.concatenate(cols, axis=0).astype(jnp.bfloat16)   # (9*C_pad, N) bf16

    # 3x3 conv (+ b1) as ONE bf16 MXU matmul with f32 accumulation, lane-dense output.
    hid = jnp.dot(w1_ref[...], im2col,
                  preferred_element_type=jnp.float32)             # (Cmid_pad, N) f32

    # SiLU in f32 (EUP sigmoid); padded rows of hid are exactly 0 and stay 0.
    hid = hid * jax.nn.sigmoid(hid)

    # 1x1 conv (bf16 MXU, f32 acc) + bias + residual (residual from the same block).
    out = jnp.dot(w2_ref[...], hid.astype(jnp.bfloat16),
                  preferred_element_type=jnp.float32)             # (C, N) f32
    out = out + b2_ref[...] + x32

    for b in range(B):
        o_ref[b] = out[:, b * HW:(b + 1) * HW].astype(o_ref.dtype)


@jax.jit
def fused_mbconv_nchw(x_nchw, w1_oihw, b1, w2_oi, b2):
    """PyTorch-compatible FusedMBConv forward.

    x_nchw: (B, C, H, W); w1_oihw: (Cmid, C, 3, 3); b1: (Cmid,);
    w2_oi: (C, Cmid); b2: (C,).  Returns (B, C, H, W).
    """
    B, C, H, W = x_nchw.shape
    Cmid = w1_oihw.shape[0]
    HW = H * W
    N = B * HW
    C_pad = _round_up(C + 1, 8)       # >= C+1 so there is always a spare "ones" row
    Cmid_pad = _round_up(Cmid, 8)

    # Free contiguous reshape; the batch fold onto lanes happens inside the kernel.
    x_flat = x_nchw.reshape(B, C, HW)

    # (Cmid, C, 3, 3) -> (Cmid_pad, 9*C_pad), tap-major / channel-minor, zero-padded,
    # with b1 folded into the center tap's all-ones padded-channel column.
    w1_r = jnp.transpose(w1_oihw, (0, 2, 3, 1)).reshape(Cmid, 9, C).astype(jnp.float32)
    w1_full = jnp.zeros((Cmid_pad, 9, C_pad), jnp.float32)
    w1_full = w1_full.at[:Cmid, :, :C].set(w1_r)
    w1_full = w1_full.at[:Cmid, 4, C_pad - 1].set(b1.astype(jnp.float32))
    w1_flat = w1_full.reshape(Cmid_pad, 9 * C_pad).astype(jnp.bfloat16)

    w2_flat = jnp.pad(w2_oi, ((0, 0), (0, Cmid_pad - Cmid))).astype(jnp.bfloat16)
    b2_col = b2.reshape(C, 1).astype(jnp.float32)

    # Precomputed 0/1 'same'-padding validity masks, one row per 3x3 tap, over the
    # fused B*HW lane axis (validity depends only on lane_index mod HW).
    p = jnp.arange(N, dtype=jnp.int32)
    hw = p % HW
    yy = hw // W
    xx = hw % W
    masks = []
    for ky in range(3):
        for kx in range(3):
            dy, dx = ky - 1, kx - 1
            valid = ((yy + dy >= 0) & (yy + dy < H) &
                     (xx + dx >= 0) & (xx + dx < W))
            masks.append(valid)
    mask_flat = jnp.stack(masks, axis=0).astype(jnp.float32)      # (9, N)

    kernel = functools.partial(_fused_mbconv_kernel, H=H, W=W, C=C, C_pad=C_pad)

    out_flat = pl.pallas_call(
        kernel,
        out_shape=jax.ShapeDtypeStruct((B, C, HW), x_nchw.dtype),
        grid=(1,),   # single step: batch folded onto lanes, no per-batch serial loop
        in_specs=[
            pl.BlockSpec((B, C, HW), lambda i: (0, 0, 0)),              # input (+residual)
            pl.BlockSpec((Cmid_pad, 9 * C_pad), lambda i: (0, 0)),      # 3x3 weights (+b1)
            pl.BlockSpec((C, Cmid_pad), lambda i: (0, 0)),              # 1x1 weights
            pl.BlockSpec((C, 1), lambda i: (0, 0)),                     # b2
            pl.BlockSpec((9, N), lambda i: (0, 0)),                     # edge masks
        ],
        out_specs=pl.BlockSpec((B, C, HW), lambda i: (0, 0, 0)),
        compiler_params=pltpu.CompilerParams(
            dimension_semantics=("arbitrary",),
            vmem_limit_bytes=32 * 1024 * 1024,
        ),
    )(x_flat, w1_flat, w2_flat, b2_col, mask_flat)

    return out_flat.reshape(B, C, H, W)


def _ref_nchw(x, w1, b1, w2, b2):
    """Pure-JAX f32 reference of the FusedMBConv forward (NCHW)."""
    xf = x.astype(jnp.float32)
    y = lax.conv_general_dilated(
        xf, w1.astype(jnp.float32), (1, 1), "SAME",
        dimension_numbers=("NCHW", "OIHW", "NCHW"))
    y = y + b1.astype(jnp.float32)[None, :, None, None]
    y = y * jax.nn.sigmoid(y)
    z = lax.conv_general_dilated(
        y, w2.astype(jnp.float32)[:, :, None, None], (1, 1), "SAME",
        dimension_numbers=("NCHW", "OIHW", "NCHW"))
    z = z + b2.astype(jnp.float32)[None, :, None, None]
    return (z + xf).astype(x.dtype)


if __name__ == "__main__":
    # Small shapes consistent with the module: batch=2, channels=4, hidden=8, 16x16.
    B, C, H, W = 2, 4, 16, 16
    HIDDEN = 8
    CMID = C + HIDDEN  # conv_input output channels

    key = jax.random.PRNGKey(0)
    k_x, k_w1, k_b1, k_w2, k_b2 = jax.random.split(key, 5)

    # PyTorch-style NCHW input and OIHW weights.
    x_nchw = jax.random.normal(k_x, (B, C, H, W), dtype=jnp.float32)
    w1 = jax.random.normal(k_w1, (CMID, C, 3, 3), dtype=jnp.float32) * 0.1
    b1 = jax.random.normal(k_b1, (CMID,), dtype=jnp.float32) * 0.1
    w2 = jax.random.normal(k_w2, (C, CMID), dtype=jnp.float32) * 0.1
    b2 = jax.random.normal(k_b2, (C,), dtype=jnp.float32) * 0.1

    out = fused_mbconv_nchw(x_nchw, w1, b1, w2, b2)
    out = jax.block_until_ready(out)
    assert out.shape == (B, C, H, W), out.shape

    ref = _ref_nchw(x_nchw, w1, b1, w2, b2)
    max_err = float(jnp.max(jnp.abs(out - ref)))
    # bf16 MXU operands (per the perf review) -> relaxed tolerance vs the f32 reference.
    assert jnp.allclose(out, ref, atol=5e-2, rtol=5e-2), max_err

    print("KERNEL_OK")
</pallas_src>

<mosaic_0001>
module attributes {stable_mosaic.version = 11 : i64} {
  func.func @_fused_mbconv_kernel(%arg0: i32, %arg1: memref<2x4x256xf32, #tpu.memory_space<vmem>>, %arg2: memref<16x72xbf16, #tpu.memory_space<vmem>>, %arg3: memref<4x16xbf16, #tpu.memory_space<vmem>>, %arg4: memref<4x1xf32, #tpu.memory_space<vmem>>, %arg5: memref<9x512xf32, #tpu.memory_space<vmem>>, %arg6: memref<2x4x256xf32, #tpu.memory_space<vmem>>) attributes {dimension_semantics = [#tpu.dimension_semantics<arbitrary>], iteration_bounds = array<i64: 1>, scalar_prefetch = 0 : i64, scratch_operands = 0 : i64, tpu.core_type = #tpu.core_type<tc>, window_params = [{pipeline_mode = #tpu.pipeline_mode<synchronous>, transform_indices = @transform_0, window_bounds = array<i64: 2, 4, 256>}, {pipeline_mode = #tpu.pipeline_mode<synchronous>, transform_indices = @transform_1, window_bounds = array<i64: 16, 72>}, {pipeline_mode = #tpu.pipeline_mode<synchronous>, transform_indices = @transform_2, window_bounds = array<i64: 4, 16>}, {pipeline_mode = #tpu.pipeline_mode<synchronous>, transform_indices = @transform_3, window_bounds = array<i64: 4, 1>}, {pipeline_mode = #tpu.pipeline_mode<synchronous>, transform_indices = @transform_4, window_bounds = array<i64: 9, 512>}, {pipeline_mode = #tpu.pipeline_mode<synchronous>, transform_indices = @transform_5, window_bounds = array<i64: 2, 4, 256>}]} {
    %c0 = arith.constant 0 : index
    %c0_0 = arith.constant 0 : index
    %c0_1 = arith.constant 0 : index
    %0 = vector.load %arg1[%c0, %c0_0, %c0_1] : memref<2x4x256xf32, #tpu.memory_space<vmem>>, vector<1x4x256xf32>
    %1 = vector.shape_cast %0 : vector<1x4x256xf32> to vector<4x256xf32>
    %c1 = arith.constant 1 : index
    %c0_2 = arith.constant 0 : index
    %c0_3 = arith.constant 0 : index
    %2 = vector.load %arg1[%c1, %c0_2, %c0_3] : memref<2x4x256xf32, #tpu.memory_space<vmem>>, vector<1x4x256xf32>
    %3 = vector.shape_cast %2 : vector<1x4x256xf32> to vector<4x256xf32>
    %4 = tpu.concatenate %1, %3 in 1 : vector<4x256xf32>, vector<4x256xf32> -> vector<4x512xf32>
    %cst = arith.constant 0.000000e+00 : f32
    %5 = vector.broadcast %cst : f32 to vector<3x512xf32>
    %cst_4 = arith.constant 1.000000e+00 : f32
    %6 = vector.broadcast %cst_4 : f32 to vector<1x512xf32>
    %7 = tpu.concatenate %4, %5, %6 in 0 : vector<4x512xf32>, vector<3x512xf32>, vector<1x512xf32> -> vector<8x512xf32>
    %c17_i32 = arith.constant 17 : i32
    %8 = tpu.dynamic_rotate %7 by %c17_i32 dim 1 : vector<8x512xf32>, i32 -> vector<8x512xf32>
    %c0_5 = arith.constant 0 : index
    %c0_6 = arith.constant 0 : index
    %9 = vector.load %arg5[%c0_5, %c0_6] : memref<9x512xf32, #tpu.memory_space<vmem>>, vector<1x512xf32>
    %10 = vector.broadcast %9 : vector<1x512xf32> to vector<8x512xf32>
    %11 = arith.mulf %8, %10 : vector<8x512xf32>
    %c16_i32 = arith.constant 16 : i32
    %12 = tpu.dynamic_rotate %7 by %c16_i32 dim 1 : vector<8x512xf32>, i32 -> vector<8x512xf32>
    %c1_7 = arith.constant 1 : index
    %c0_8 = arith.constant 0 : index
    %13 = vector.load %arg5[%c1_7, %c0_8] : memref<9x512xf32, #tpu.memory_space<vmem>>, vector<1x512xf32>
    %14 = vector.broadcast %13 : vector<1x512xf32> to vector<8x512xf32>
    %15 = arith.mulf %12, %14 : vector<8x512xf32>
    %c15_i32 = arith.constant 15 : i32
    %16 = tpu.dynamic_rotate %7 by %c15_i32 dim 1 : vector<8x512xf32>, i32 -> vector<8x512xf32>
    %c2 = arith.constant 2 : index
    %c0_9 = arith.constant 0 : index
    %17 = vector.load %arg5[%c2, %c0_9] : memref<9x512xf32, #tpu.memory_space<vmem>>, vector<1x512xf32>
    %18 = vector.broadcast %17 : vector<1x512xf32> to vector<8x512xf32>
    %19 = arith.mulf %16, %18 : vector<8x512xf32>
    %c1_i32 = arith.constant 1 : i32
    %20 = tpu.dynamic_rotate %7 by %c1_i32 dim 1 : vector<8x512xf32>, i32 -> vector<8x512xf32>
    %c3 = arith.constant 3 : index
    %c0_10 = arith.constant 0 : index
    %21 = vector.load %arg5[%c3, %c0_10] : memref<9x512xf32, #tpu.memory_space<vmem>>, vector<1x512xf32>
    %22 = vector.broadcast %21 : vector<1x512xf32> to vector<8x512xf32>
    %23 = arith.mulf %20, %22 : vector<8x512xf32>
    %c511_i32 = arith.constant 511 : i32
    %24 = tpu.dynamic_rotate %7 by %c511_i32 dim 1 : vector<8x512xf32>, i32 -> vector<8x512xf32>
    %c5 = arith.constant 5 : index
    %c0_11 = arith.constant 0 : index
    %25 = vector.load %arg5[%c5, %c0_11] : memref<9x512xf32, #tpu.memory_space<vmem>>, vector<1x512xf32>
    %26 = vector.broadcast %25 : vector<1x512xf32> to vector<8x512xf32>
    %27 = arith.mulf %24, %26 : vector<8x512xf32>
    %c497_i32 = arith.constant 497 : i32
    %28 = tpu.dynamic_rotate %7 by %c497_i32 dim 1 : vector<8x512xf32>, i32 -> vector<8x512xf32>
    %c6 = arith.constant 6 : index
    %c0_12 = arith.constant 0 : index
    %29 = vector.load %arg5[%c6, %c0_12] : memref<9x512xf32, #tpu.memory_space<vmem>>, vector<1x512xf32>
    %30 = vector.broadcast %29 : vector<1x512xf32> to vector<8x512xf32>
    %31 = arith.mulf %28, %30 : vector<8x512xf32>
    %c496_i32 = arith.constant 496 : i32
    %32 = tpu.dynamic_rotate %7 by %c496_i32 dim 1 : vector<8x512xf32>, i32 -> vector<8x512xf32>
    %c7 = arith.constant 7 : index
    %c0_13 = arith.constant 0 : index
    %33 = vector.load %arg5[%c7, %c0_13] : memref<9x512xf32, #tpu.memory_space<vmem>>, vector<1x512xf32>
    %34 = vector.broadcast %33 : vector<1x512xf32> to vector<8x512xf32>
    %35 = arith.mulf %32, %34 : vector<8x512xf32>
    %c495_i32 = arith.constant 495 : i32
    %36 = tpu.dynamic_rotate %7 by %c495_i32 dim 1 : vector<8x512xf32>, i32 -> vector<8x512xf32>
    %c8 = arith.constant 8 : index
    %c0_14 = arith.constant 0 : index
    %37 = vector.load %arg5[%c8, %c0_14] : memref<9x512xf32, #tpu.memory_space<vmem>>, vector<1x512xf32>
    %38 = vector.broadcast %37 : vector<1x512xf32> to vector<8x512xf32>
    %39 = arith.mulf %36, %38 : vector<8x512xf32>
    %40 = tpu.concatenate %11, %15, %19, %23, %7, %27, %31, %35, %39 in 0 : vector<8x512xf32>, vector<8x512xf32>, vector<8x512xf32>, vector<8x512xf32>, vector<8x512xf32>, vector<8x512xf32>, vector<8x512xf32>, vector<8x512xf32>, vector<8x512xf32> -> vector<72x512xf32>
    %41 = arith.truncf %40 : vector<72x512xf32> to vector<72x512xbf16>
    %c0_15 = arith.constant 0 : index
    %c0_16 = arith.constant 0 : index
    %42 = vector.load %arg2[%c0_15, %c0_16] : memref<16x72xbf16, #tpu.memory_space<vmem>>, vector<16x72xbf16>
    %cst_17 = arith.constant dense<0.000000e+00> : vector<16x512xf32>
    %43 = tpu.matmul %42, %41, %cst_17 {dimension_numbers = #tpu.dot_dimension_numbers<[1], [0], [0], [1], [0, 0, 1, 1], [], []>} : vector<16x72xbf16>, vector<72x512xbf16>, vector<16x512xf32> -> vector<16x512xf32>
    %44 = arith.negf %43 : vector<16x512xf32>
    %45 = math.exp %44 : vector<16x512xf32>
    %cst_18 = arith.constant 1.000000e+00 : f32
    %46 = vector.broadcast %cst_18 : f32 to vector<16x512xf32>
    %47 = arith.addf %46, %45 : vector<16x512xf32>
    %48 = arith.divf %46, %47 : vector<16x512xf32>
    %49 = arith.mulf %43, %48 : vector<16x512xf32>
    %c0_19 = arith.constant 0 : index
    %c0_20 = arith.constant 0 : index
    %50 = vector.load %arg3[%c0_19, %c0_20] : memref<4x16xbf16, #tpu.memory_space<vmem>>, vector<4x16xbf16>
    %51 = arith.truncf %49 : vector<16x512xf32> to vector<16x512xbf16>
    %cst_21 = arith.constant dense<0.000000e+00> : vector<4x512xf32>
    %52 = tpu.matmul %50, %51, %cst_21 {dimension_numbers = #tpu.dot_dimension_numbers<[1], [0], [0], [1], [0, 0, 1, 1], [], []>} : vector<4x16xbf16>, vector<16x512xbf16>, vector<4x512xf32> -> vector<4x512xf32>
    %c0_22 = arith.constant 0 : index
    %c0_23 = arith.constant 0 : index
    %53 = vector.load %arg4[%c0_22, %c0_23] : memref<4x1xf32, #tpu.memory_space<vmem>>, vector<4x1xf32>
    %54 = vector.broadcast %53 : vector<4x1xf32> to vector<4x512xf32>
    %55 = arith.addf %52, %54 : vector<4x512xf32>
    %56 = arith.addf %55, %4 : vector<4x512xf32>
    %57 = vector.extract_strided_slice %56 {offsets = [0, 0], sizes = [4, 256], strides = [1, 1]} : vector<4x512xf32> to vector<4x256xf32>
    %c0_24 = arith.constant 0 : index
    %c0_25 = arith.constant 0 : index
    %c0_26 = arith.constant 0 : index
    %58 = vector.load %arg6[%c0_24, %c0_25, %c0_26] : memref<2x4x256xf32, #tpu.memory_space<vmem>>, vector<1x4x256xf32>
    %59 = vector.shape_cast %58 : vector<1x4x256xf32> to vector<4x256xf32>
    %60 = vector.shape_cast %57 : vector<4x256xf32> to vector<1x4x256xf32>
    tpu.vector_store %arg6[%c0_24, %c0_25, %c0_26], %60 {strides = array<i32>} : memref<2x4x256xf32, #tpu.memory_space<vmem>>, vector<1x4x256xf32>,
    %61 = vector.extract_strided_slice %56 {offsets = [0, 256], sizes = [4, 256], strides = [1, 1]} : vector<4x512xf32> to vector<4x256xf32>
    %c1_27 = arith.constant 1 : index
    %c0_28 = arith.constant 0 : index
    %c0_29 = arith.constant 0 : index
    %62 = vector.load %arg6[%c1_27, %c0_28, %c0_29] : memref<2x4x256xf32, #tpu.memory_space<vmem>>, vector<1x4x256xf32>
    %63 = vector.shape_cast %62 : vector<1x4x256xf32> to vector<4x256xf32>
    %64 = vector.shape_cast %61 : vector<4x256xf32> to vector<1x4x256xf32>
    tpu.vector_store %arg6[%c1_27, %c0_28, %c0_29], %64 {strides = array<i32>} : memref<2x4x256xf32, #tpu.memory_space<vmem>>, vector<1x4x256xf32>,
    return
  }
  func.func @transform_0(%arg0: i32) -> (i32, i32, i32) {
    %c0_i32 = arith.constant 0 : i32
    %c0_i32_0 = arith.constant 0 : i32
    %c0_i32_1 = arith.constant 0 : i32
    %c0_i32_2 = arith.constant 0 : i32
    return %c0_i32, %c0_i32_0, %c0_i32_1 : i32, i32, i32
  }
  func.func @transform_1(%arg0: i32) -> (i32, i32) {
    %c0_i32 = arith.constant 0 : i32
    %c0_i32_0 = arith.constant 0 : i32
    %c0_i32_1 = arith.constant 0 : i32
    return %c0_i32, %c0_i32_0 : i32, i32
  }
  func.func @transform_2(%arg0: i32) -> (i32, i32) {
    %c0_i32 = arith.constant 0 : i32
    %c0_i32_0 = arith.constant 0 : i32
    %c0_i32_1 = arith.constant 0 : i32
    return %c0_i32, %c0_i32_0 : i32, i32
  }
  func.func @transform_3(%arg0: i32) -> (i32, i32) {
    %c0_i32 = arith.constant 0 : i32
    %c0_i32_0 = arith.constant 0 : i32
    %c0_i32_1 = arith.constant 0 : i32
    return %c0_i32, %c0_i32_0 : i32, i32
  }
  func.func @transform_4(%arg0: i32) -> (i32, i32) {
    %c0_i32 = arith.constant 0 : i32
    %c0_i32_0 = arith.constant 0 : i32
    %c0_i32_1 = arith.constant 0 : i32
    return %c0_i32, %c0_i32_0 : i32, i32
  }
  func.func @transform_5(%arg0: i32) -> (i32, i32, i32) {
    %c0_i32 = arith.constant 0 : i32
    %c0_i32_0 = arith.constant 0 : i32
    %c0_i32_1 = arith.constant 0 : i32
    %c0_i32_2 = arith.constant 0 : i32
    return %c0_i32, %c0_i32_0, %c0_i32_1 : i32, i32, i32
  }
}

</mosaic_0001>

<bundles_post_ra>
// kernel: fused_mbconv_nchw.1
= control target key start
LH: loop header
LB: loop body
LE: loop exit
PB: predicated region body
PF: predicated region fallthrough
CT: control target
= control target key end

     0   :  { %vm30_vm0 = vcmask 1043456   ;;  %vm35_vm1 = vcmask 1046528   ;;  %s732_s22 = smov 16   ;;  %s733_s23 = smov 15   ;;  %v738_v12 = vmov 0   ;;  %v48_v13 = vlaneseq  ;;  %s1006_s0 = inlined_call_operand.vmem [shape: f32[2,4,256], index: 0, kind: input, shape index: {}]   ;;  %s1007_s1 = inlined_call_operand.vmem [shape: bf16[16,72], index: 1, kind: input, shape index: {}]   ;;  %s1008_s4 = inlined_call_operand.vmem [shape: f32[9,512], index: 4, kind: input, shape index: {}]   ;;  %s1009_s3 = inlined_call_operand.vmem [shape: f32[4,1], index: 3, kind: input, shape index: {}]   ;;  %s1010_s2 = inlined_call_operand.vmem [shape: bf16[4,16], index: 2, kind: input, shape index: {}]   ;;  %s1011_s5 = inlined_call_operand.vmem [shape: f32[2,4,256], index: 5, kind: output, shape index: {}]  }
   0x1   :  { %v773_v0 = vld [vmem:[%s1006_s0 + $0x8] sm:$0xff]  ;;  %v778_v1 = vld [vmem:[%s1006_s0] sm:$0xff]  ;;  %s731_s0 = smov 17   ;;  %s734_s24 = smov 1   ;;  %436 = vmatprep.mubr.bf16.mxu0 %v738_v12  ;;  %479 = vmatprep.mubr.bf16.mxu1 %v738_v12  ;;  %vm388_vm10 = vcmask 588800   ;;  %vm557_vm11 = vcmask 130048  }
   0x2   :  { %v33_v2 = vsel %vm30_vm0, %v773_v0, 0.0  ;;  %v31_v3 = vsel %vm30_vm0, %v778_v1, 0.0  ;;  %v786_v4 = vcombine.high %v773_v0, %v773_v0  ;;  %v790_v5 = vcombine.high %v778_v1, %v778_v1  ;;  %s735_s25 = smov 127   ;;  %s736_s26 = smov 113   ;;  %695 = vset.pattern.permute.xlu0 %v738_v12 }
   0x3   :  { %v792_v6 = vsel %vm35_vm1, %v33_v2, 1.0  ;;  %v794_v7 = vsel %vm35_vm1, %v31_v3, 1.0  ;;  %s737_s27 = smov 112   ;;  %s739_s28 = smov 111   ;;  %v58_v14 = vshrl.u32 %v48_v13, 7  ;;  %v839_v17 = vand.u32 127, %v48_v13 }
   0x4   :  { %44 = vrot.lane.b32.xlu1 %v792_v6, %s731_s0  ;;  %40 = vrot.lane.b32.xlu0 %v794_v7, %s731_s0  ;;  %v34_v8 = vsel %vm30_vm0, %v786_v4, 0.0  ;;  %v32_v9 = vsel %vm30_vm0, %v790_v5, 0.0  ;;  %v55_v19 = vld [vmem:[%s1008_s4] ss:$8 sm:$0xf] }
   0x5   :  { %v802_v10 = vsel %vm35_vm1, %v34_v8, 1.0  ;;  %v804_v11 = vsel %vm35_vm1, %v32_v9, 1.0  ;;  %v841_v18 = vsub.s32 1, %v58_v14  ;;  %v663_v20 = vld [vmem:[%s1008_s4 + $0x1] ss:$8 sm:$0xf] }
   0x6   :  { %vm50_vm2 = vcmp.lt.s32.totalorder %v839_v17, 17  ;;  %v850_v21 = vsub.s32 0, %v58_v14  ;;  %v852_v23 = vsub.s32 2, %v58_v14  ;;  %v854_v25 = vsub.s32 3, %v58_v14 }
   0x7   :  { %vm89_vm3 = vcmp.lt.s32.totalorder %v839_v17, 16  ;;  %v64_v26 = vrot.slane %v55_v19, %v841_v18  ;;  %v104_v27 = vrot.slane %v663_v20, %v841_v18  ;;  %v664_v60 = vld [vmem:[%s1008_s4 + $0x2] ss:$8 sm:$0xf]  ;;  %vm129_vm4 = vcmp.lt.s32.totalorder %v839_v17, 15 }
   0x8   :  { %46 = vrot.lane.b32.xlu1 %v802_v10, %s731_s0  ;;  %42 = vrot.lane.b32.xlu0 %v804_v11, %s731_s0  ;;  %v60_v29 = vrot.slane %v55_v19, %v850_v21  ;;  %v68_v30 = vrot.slane %v55_v19, %v852_v23  ;;  %v100_v33 = vrot.slane %v663_v20, %v850_v21  ;;  %v665_v61 = vld [vmem:[%s1008_s4 + $0x3] ss:$8 sm:$0xf]  ;;  %vm169_vm5 = vcmp.lt.s32.totalorder %v839_v17, 1 }
   0x9   :  { %v108_v36 = vrot.slane %v663_v20, %v852_v23  ;;  %v72_v37 = vrot.slane %v55_v19, %v854_v25  ;;  %v112_v41 = vrot.slane %v663_v20, %v854_v25  ;;  %v144_v2 = vrot.slane %v664_v60, %v841_v18 }
   0xa   :  { %v184_v3 = vrot.slane %v665_v61, %v841_v18  ;;  %v140_v9 = vrot.slane %v664_v60, %v850_v21  ;;  %v148_v13 = vrot.slane %v664_v60, %v852_v23  ;;  %v152_v14 = vrot.slane %v664_v60, %v854_v25 }
   0xb   :  { %vm209_vm6 = vcmp.lt.s32.totalorder %v839_v17, 127  ;;  %vm289_vm7 = vcmp.lt.s32.totalorder %v839_v17, 112  ;;  %vm249_vm8 = vcmp.lt.s32.totalorder %v839_v17, 113  ;;  %vm329_vm9 = vcmp.lt.s32.totalorder %v839_v17, 111  ;;  %v698_v17 = vld [vmem:[%s1007_s1] sm:$0xff]  }
   0xc   :  { %83 = vrot.lane.b32.xlu1 %v804_v11, %s732_s22  ;;  %81 = vrot.lane.b32.xlu0 %v794_v7, %s732_s22 }
  0x10   :  { %87 = vrot.lane.b32.xlu1 %v802_v10, %s732_s22  ;;  %85 = vrot.lane.b32.xlu0 %v792_v6, %s732_s22 }
  0x14   :  { %123 = vrot.lane.b32.xlu1 %v804_v11, %s733_s23  ;;  %121 = vrot.lane.b32.xlu0 %v794_v7, %s733_s23 }
  0x18   :  { %127 = vrot.lane.b32.xlu1 %v802_v10, %s733_s23  ;;  %125 = vrot.lane.b32.xlu0 %v792_v6, %s733_s23 }
  0x1c   :  { %163 = vrot.lane.b32.xlu1 %v804_v11, %s734_s24  ;;  %161 = vrot.lane.b32.xlu0 %v794_v7, %s734_s24 }
  0x20   :  { %167 = vrot.lane.b32.xlu1 %v802_v10, %s734_s24  ;;  %165 = vrot.lane.b32.xlu0 %v792_v6, %s734_s24 }
  0x24   :  { %203 = vrot.lane.b32.xlu1 %v804_v11, %s735_s25  ;;  %201 = vrot.lane.b32.xlu0 %v794_v7, %s735_s25 }
  0x28   :  { %207 = vrot.lane.b32.xlu1 %v802_v10, %s735_s25  ;;  %205 = vrot.lane.b32.xlu0 %v792_v6, %s735_s25 }
  0x2c   :  { %243 = vrot.lane.b32.xlu1 %v804_v11, %s736_s26  ;;  %241 = vrot.lane.b32.xlu0 %v794_v7, %s736_s26 }
  0x30   :  { %247 = vrot.lane.b32.xlu1 %v802_v10, %s736_s26  ;;  %245 = vrot.lane.b32.xlu0 %v792_v6, %s736_s26 }
  0x34   :  { %283 = vrot.lane.b32.xlu1 %v804_v11, %s737_s27  ;;  %281 = vrot.lane.b32.xlu0 %v794_v7, %s737_s27 }
  0x38   :  { %287 = vrot.lane.b32.xlu1 %v802_v10, %s737_s27  ;;  %285 = vrot.lane.b32.xlu0 %v792_v6, %s737_s27 }
  0x3c   :  { %323 = vrot.lane.b32.xlu1 %v804_v11, %s739_s28  ;;  %321 = vrot.lane.b32.xlu0 %v794_v7, %s739_s28 }
  0x40   :  { %327 = vrot.lane.b32.xlu1 %v802_v10, %s739_s28  ;;  %325 = vrot.lane.b32.xlu0 %v792_v6, %s739_s28 }
  0x76   :  { %v45_v15 = vpop.permute.xlu1 %44  ;;  %v41_v16 = vpop.permute.xlu0 %40 }
  0x7a   :  { %v47_v22 = vpop.permute.xlu1 %46  ;;  %v43_v24 = vpop.permute.xlu0 %42 }
  0x7b   :  { %v53_v28 = vsel %vm50_vm2, %v41_v16, %v43_v24  ;;  %v54_v34 = vsel %vm50_vm2, %v47_v22, %v41_v16  ;;  %v52_v38 = vsel %vm50_vm2, %v43_v24, %v45_v15  ;;  %v51_v42 = vsel %vm50_vm2, %v45_v15, %v47_v22 }
  0x7c   :  { %v78_v39 = vmul.f32 %v64_v26, %v53_v28  ;;  %v77_v43 = vmul.f32 %v60_v29, %v54_v34  ;;  %v79_v47 = vmul.f32 %v68_v30, %v52_v38  ;;  %v80_v53 = vmul.f32 %v72_v37, %v51_v42 }
  0x7d   :  { %v180_v22 = vrot.slane %v665_v61, %v850_v21  ;;  %v188_v24 = vrot.slane %v665_v61, %v852_v23  ;;  %v192_v29 = vrot.slane %v665_v61, %v854_v25 }
  0x7e   :  { %v84_v31 = vpop.permute.xlu1 %83  ;;  %v82_v32 = vpop.permute.xlu0 %81 }
  0x7f   :  { %v92_v35 = vsel %vm89_vm3, %v82_v32, %v84_v31 }
  0x80   :  { %v118_v40 = vmul.f32 %v104_v27, %v92_v35 }
  0x82   :  { %v88_v44 = vpop.permute.xlu1 %87  ;;  %v86_v45 = vpop.permute.xlu0 %85  ;;  %v362_v46 = vpack.c.bf16 %v118_v40, %v78_v39 }
  0x83   :  { %v93_v48 = vsel %vm89_vm3, %v88_v44, %v82_v32  ;;  %v90_v49 = vsel %vm89_vm3, %v86_v45, %v88_v44  ;;  %v91_v50 = vsel %vm89_vm3, %v84_v31, %v86_v45 }
  0x84   :  { %v117_v51 = vmul.f32 %v100_v33, %v93_v48  ;;  %v119_v52 = vmul.f32 %v108_v36, %v91_v50  ;;  %404 = vmatprep.subr.bf16.mxu0 %v362_v46  ;;  %v120_v54 = vmul.f32 %v112_v41, %v90_v49 }
  0x86   :  { %v124_v55 = vpop.permute.xlu1 %123  ;;  %v122_v56 = vpop.permute.xlu0 %121  ;;  %v361_v57 = vpack.c.bf16 %v117_v51, %v77_v43  ;;  %v364_v58 = vpack.c.bf16 %v120_v54, %v80_v53  ;;  %v363_v59 = vpack.c.bf16 %v119_v52, %v79_v47  ;;  %v666_v43 = vld [vmem:[%s1008_s4 + $0x5] ss:$8 sm:$0xf] }
  0x87   :  { %v132_v8 = vsel %vm129_vm4, %v122_v56, %v124_v55  ;;  %v220_v49 = vrot.slane %v666_v43, %v850_v21  ;;  %v232_v50 = vrot.slane %v666_v43, %v854_v25  ;;  %v224_v52 = vrot.slane %v666_v43, %v841_v18 }
  0x88   :  { %405 = vmatpush1.bf16.msra.mxu0 %v361_v57  ;;  %447 = vmatprep.subr.bf16.mxu1 %v364_v58  ;;  %v158_v26 = vmul.f32 %v144_v2, %v132_v8  ;;  %v228_v53 = vrot.slane %v666_v43, %v852_v23 }
  0x89   :  { %448 = vmatpush1.bf16.msra.mxu1 %v363_v59 }
  0x8a   :  { %v128_v62 = vpop.permute.xlu1 %127  ;;  %v126_v63 = vpop.permute.xlu0 %125 }
  0x8b   :  { %v133_v19 = vsel %vm129_vm4, %v128_v62, %v122_v56  ;;  %v131_v27 = vsel %vm129_vm4, %v124_v55, %v126_v63  ;;  %v130_v30 = vsel %vm129_vm4, %v126_v63, %v128_v62 }
  0x8c   :  { %v157_v31 = vmul.f32 %v140_v9, %v133_v19  ;;  %v159_v35 = vmul.f32 %v148_v13, %v131_v27  ;;  %v160_v39 = vmul.f32 %v152_v14, %v130_v30  ;;  %v669_v27 = vld [vmem:[%s1008_s4 + $0x20] ss:$8 sm:$0xf] }
  0x8e   :  { %v164_v15 = vpop.permute.xlu1 %163  ;;  %v162_v16 = vpop.permute.xlu0 %161 }
  0x8f   :  { %v172_v20 = vsel %vm169_vm5, %v162_v16, %v164_v15 }
  0x90   :  { %v198_v28 = vmul.f32 %v184_v3, %v172_v20 }
  0x92   :  { %v168_v32 = vpop.permute.xlu1 %167  ;;  %v166_v33 = vpop.permute.xlu0 %165  ;;  %v366_v34 = vpack.c.bf16 %v198_v28, %v158_v26 }
  0x93   :  { %v173_v36 = vsel %vm169_vm5, %v168_v32, %v162_v16  ;;  %v170_v37 = vsel %vm169_vm5, %v166_v33, %v168_v32  ;;  %v171_v38 = vsel %vm169_vm5, %v164_v15, %v166_v33  ;;  %v668_v16 = vld [vmem:[%s1008_s4 + $0x7] ss:$8 sm:$0xf] }
  0x94   :  { %v197_v40 = vmul.f32 %v180_v22, %v173_v36  ;;  %v199_v41 = vmul.f32 %v188_v24, %v171_v38  ;;  %v200_v42 = vmul.f32 %v192_v29, %v170_v37  ;;  %406 = vmatprep.subr.bf16.mxu0 %v366_v34  ;;  %v300_v26 = vrot.slane %v668_v16, %v850_v21 }
  0x95   :  { %v312_v29 = vrot.slane %v668_v16, %v854_v25  ;;  %v304_v30 = vrot.slane %v668_v16, %v841_v18 }
  0x96   :  { %v204_v44 = vpop.permute.xlu1 %203  ;;  %v202_v45 = vpop.permute.xlu0 %201  ;;  %v365_v46 = vpack.c.bf16 %v197_v40, %v157_v31  ;;  %v368_v47 = vpack.c.bf16 %v200_v42, %v160_v39  ;;  %v367_v48 = vpack.c.bf16 %v199_v41, %v159_v35  ;;  %v308_v31 = vrot.slane %v668_v16, %v852_v23 }
  0x97   :  { %v212_v51 = vsel %vm209_vm6, %v202_v45, %v204_v44  ;;  %v340_v39 = vrot.slane %v669_v27, %v850_v21 }
  0x98   :  { %407 = vmatpush1.bf16.msra.mxu0 %v365_v46  ;;  %449 = vmatprep.subr.bf16.mxu1 %v368_v47  ;;  %v237_v56 = vmul.f32 %v220_v49, %v212_v51 }
  0x99   :  { %450 = vmatpush1.bf16.msra.mxu1 %v367_v48 }
  0x9a   :  { %v208_v54 = vpop.permute.xlu1 %207  ;;  %v206_v55 = vpop.permute.xlu0 %205  ;;  %v369_v13 = vpack.c.bf16 %v237_v56, %v794_v7 }
  0x9b   :  { %v213_v57 = vsel %vm209_vm6, %v208_v54, %v202_v45  ;;  %v210_v58 = vsel %vm209_vm6, %v206_v55, %v208_v54  ;;  %v211_v59 = vsel %vm209_vm6, %v204_v44, %v206_v55  ;;  %v352_v55 = vrot.slane %v669_v27, %v854_v25 }
  0x9c   :  { %v240_v60 = vmul.f32 %v232_v50, %v213_v57  ;;  %v238_v61 = vmul.f32 %v224_v52, %v211_v59  ;;  %v239_v62 = vmul.f32 %v228_v53, %v210_v58  ;;  %v344_v57 = vrot.slane %v669_v27, %v841_v18 }
  0x9d   :  { %v348_v58 = vrot.slane %v669_v27, %v852_v23 }
  0x9e   :  { %v244_v63 = vpop.permute.xlu1 %243  ;;  %v242_v2 = vpop.permute.xlu0 %241  ;;  %v370_v3 = vpack.c.bf16 %v238_v61, %v804_v11  ;;  %v372_v8 = vpack.c.bf16 %v240_v60, %v802_v10  ;;  %v371_v9 = vpack.c.bf16 %v239_v62, %v792_v6  ;;  %v667_v11 = vld [vmem:[%s1008_s4 + $0x6] ss:$8 sm:$0xf] }
  0x9f   :  { %v272_v6 = vrot.slane %v667_v11, %v854_v25  ;;  %v264_v7 = vrot.slane %v667_v11, %v841_v18  ;;  %v268_v22 = vrot.slane %v667_v11, %v852_v23  ;;  %v260_v32 = vrot.slane %v667_v11, %v850_v21 }
  0xa0   :  { %408 = vmatprep.subr.bf16.mxu0 %v370_v3  ;;  %451 = vmatprep.subr.bf16.mxu1 %v372_v8  ;;  %v252_v34 = vsel %vm249_vm8, %v242_v2, %v244_v63 }
  0xa1   :  { %409 = vmatpush1.bf16.msra.mxu0 %v369_v13  ;;  %452 = vmatpush1.bf16.msra.mxu1 %v371_v9  ;;  %v277_v48 = vmul.f32 %v260_v32, %v252_v34 }
  0xa2   :  { %v248_v14 = vpop.permute.xlu1 %247  ;;  %v246_v15 = vpop.permute.xlu0 %245 }
  0xa3   :  { %v253_v20 = vsel %vm249_vm8, %v248_v14, %v242_v2  ;;  %v251_v24 = vsel %vm249_vm8, %v244_v63, %v246_v15  ;;  %v250_v33 = vsel %vm249_vm8, %v246_v15, %v248_v14  ;;  %v551_v15 = vld [vmem:[%s1009_s3] sm:$0xf] }
  0xa4   :  { %v280_v35 = vmul.f32 %v272_v6, %v253_v20  ;;  %v278_v36 = vmul.f32 %v264_v7, %v251_v24  ;;  %v279_v44 = vmul.f32 %v268_v22, %v250_v33  ;;  %554 = vperm.xlu0 %695, %v551_v15  }
  0xa6   :  { %v284_v10 = vpop.permute.xlu1 %283  ;;  %v282_v19 = vpop.permute.xlu0 %281 }
  0xa7   :  { %v292_v28 = vsel %vm289_vm7, %v282_v19, %v284_v10 }
  0xa8   :  { %v317_v40 = vmul.f32 %v300_v26, %v292_v28 }
  0xaa   :  { %v288_v37 = vpop.permute.xlu1 %287  ;;  %v286_v38 = vpop.permute.xlu0 %285  ;;  %v373_v54 = vpack.c.bf16 %v317_v40, %v277_v48 }
  0xab   :  { %v293_v41 = vsel %vm289_vm7, %v288_v37, %v282_v19  ;;  %v290_v42 = vsel %vm289_vm7, %v286_v38, %v288_v37  ;;  %v291_v43 = vsel %vm289_vm7, %v284_v10, %v286_v38 }
  0xac   :  { %v320_v45 = vmul.f32 %v312_v29, %v293_v41  ;;  %v318_v46 = vmul.f32 %v304_v30, %v291_v43  ;;  %v319_v47 = vmul.f32 %v308_v31, %v290_v42 }
  0xae   :  { %v324_v49 = vpop.permute.xlu1 %323  ;;  %v322_v50 = vpop.permute.xlu0 %321  ;;  %v374_v51 = vpack.c.bf16 %v318_v46, %v278_v36  ;;  %v376_v52 = vpack.c.bf16 %v320_v45, %v280_v35  ;;  %v375_v21 = vpack.c.bf16 %v319_v47, %v279_v44 }
  0xaf   :  { %v332_v53 = vsel %vm329_vm9, %v322_v50, %v324_v49 }
  0xb0   :  { %v357_v56 = vmul.f32 %v340_v39, %v332_v53  ;;  %410 = vmatprep.subr.bf16.mxu0 %v374_v51  ;;  %453 = vmatprep.subr.bf16.mxu1 %v376_v52 }
  0xb1   :  { %411 = vmatpush1.bf16.msra.mxu0 %v373_v54  ;;  %454 = vmatpush1.bf16.msra.mxu1 %v375_v21 }
  0xb2   :  { %v328_v59 = vpop.permute.xlu1 %327  ;;  %v326_v60 = vpop.permute.xlu0 %325  ;;  %v377_v63 = vpack.c.bf16 %v357_v56, %v357_v56 }
  0xb3   :  { %v333_v61 = vsel %vm329_vm9, %v328_v59, %v322_v50  ;;  %v330_v62 = vsel %vm329_vm9, %v326_v60, %v328_v59  ;;  %v331_v25 = vsel %vm329_vm9, %v324_v49, %v326_v60 }
  0xb4   :  { %v360_v2 = vmul.f32 %v352_v55, %v333_v61  ;;  %v358_v3 = vmul.f32 %v344_v57, %v331_v25  ;;  %v359_v8 = vmul.f32 %v348_v58, %v330_v62  ;;  %v393_v13 = vsel %vm30_vm0, %v377_v63, 0 }
  0xb6   :  { %v380_v18 = vpack.c.bf16 %v360_v2, %v360_v2  ;;  %v378_v9 = vpack.c.bf16 %v358_v3, %v358_v3  ;;  %v379_v23 = vpack.c.bf16 %v359_v8, %v359_v8  ;;  %v546_v8 = vld [vmem:[%s1010_s2] sm:$0x3] }
  0xb8   :  { %671 = vmatprep.subr.msk.bf16.mxu0 %vm30_vm0, %v378_v9  ;;  %673 = vmatprep.subr.msk.bf16.mxu1 %vm30_vm0, %v380_v18  ;;  %v399_v14 = vsel %vm30_vm0, %v379_v23, 0 }
  0xb9   :  { %413 = vmatpush1.bf16.msra.mxu0 %v393_v13  ;;  %456 = vmatpush1.bf16.msra.mxu1 %v399_v14 }
  0xbc   :  { %672 = vmatmul.mubr.msk.bf16.vlgmr.msra.gmra.mrb[0].mxu0 %vm388_vm10, %v698_v17  ;;  %674 = vmatmul.mubr.msk.bf16.vlgmr.msra.gmra.mrb[0].mxu1 %vm388_vm10, %v698_v17 }
  0xbd   :  { %593 = vmatprep.mubr.bf16.mxu0 %v738_v12  ;;  %634 = vmatprep.mubr.bf16.mxu1 %v738_v12 }
 0x123   :  { %v555_v18 = vpop.permute.xlu0 %554 }
 0x18f   :  { %v438_v16 = vpop.f32.mrb[0].mxu0  ;;  %v481_v11 = vpop.f32.mrb[0].mxu1 }
 0x190   :  { %v675_v6 = vmul.f32 -1.442695, %v438_v16  ;;  %v677_v7 = vmul.f32 -1.442695, %v481_v11  ;;  %v440_v10 = vpop.f32.mrb[1].mxu0  ;;  %v483_v19 = vpop.f32.mrb[1].mxu1 }
 0x191   :  { %v676_v20 = vmul.f32 -1.442695, %v440_v10  ;;  %v678_v22 = vmul.f32 -1.442695, %v483_v19  ;;  %v442_v24 = vpop.f32.mrb[2].mxu0  ;;  %v485_v26 = vpop.f32.mrb[2].mxu1 }
 0x192   :  { %699 = vpow2.f32 %v675_v6  ;;  %v679_v27 = vmul.f32 -1.442695, %v442_v24  ;;  %v444_v28 = vpop.f32.mrb[3].mxu0  ;;  %v487_v29 = vpop.f32.mrb[3].mxu1  ;;  %v681_v12 = vmul.f32 -1.442695, %v485_v26 }
 0x193   :  { %701 = vpow2.f32 %v677_v7  ;;  %v680_v30 = vmul.f32 -1.442695, %v444_v28  ;;  %v682_v31 = vmul.f32 -1.442695, %v487_v29 }
 0x194   :  { %703 = vpow2.f32 %v676_v20 }
 0x195   :  { %705 = vpow2.f32 %v678_v22 }
 0x196   :  { %707 = vpow2.f32 %v679_v27 }
 0x197   :  { %709 = vpow2.f32 %v681_v12 }
 0x198   :  { %711 = vpow2.f32 %v680_v30 }
 0x199   :  { %713 = vpow2.f32 %v682_v31 }
 0x19c   :  { %v700_v32 = vpop.eup %699 }
 0x19d   :  { %v702_v33 = vpop.eup %701  ;;  %v514_v34 = vadd.f32 1.0, %v700_v32 }
 0x19e   :  { %v704_v35 = vpop.eup %703  ;;  %v516_v36 = vadd.f32 1.0, %v702_v33 }
 0x19f   :  { %v706_v37 = vpop.eup %705  ;;  %715 = vrcp.f32 %v514_v34  ;;  %v515_v38 = vadd.f32 1.0, %v704_v35 }
 0x1a0   :  { %v708_v39 = vpop.eup %707  ;;  %717 = vrcp.f32 %v516_v36  ;;  %v517_v40 = vadd.f32 1.0, %v706_v37 }
 0x1a1   :  { %v710_v41 = vpop.eup %709  ;;  %719 = vrcp.f32 %v515_v38  ;;  %v518_v42 = vadd.f32 1.0, %v708_v39 }
 0x1a2   :  { %v712_v43 = vpop.eup %711  ;;  %721 = vrcp.f32 %v517_v40  ;;  %v520_v44 = vadd.f32 1.0, %v710_v41 }
 0x1a3   :  { %v714_v45 = vpop.eup %713  ;;  %723 = vrcp.f32 %v518_v42  ;;  %v519_v46 = vadd.f32 1.0, %v712_v43 }
 0x1a4   :  { %725 = vrcp.f32 %v520_v44  ;;  %v521_v47 = vadd.f32 1.0, %v714_v45 }
 0x1a5   :  { %727 = vrcp.f32 %v519_v46 }
 0x1a6   :  { %729 = vrcp.f32 %v521_v47 }
 0x1a9   :  { %v716_v48 = vpop.eup %715 }
 0x1aa   :  { %v718_v49 = vpop.eup %717  ;;  %v538_v53 = vmul.f32 %v716_v48, %v438_v16 }
 0x1ab   :  { %v720_v50 = vpop.eup %719  ;;  %v540_v56 = vmul.f32 %v718_v49, %v481_v11 }
 0x1ac   :  { %v722_v51 = vpop.eup %721  ;;  %v539_v59 = vmul.f32 %v720_v50, %v440_v10 }
 0x1ad   :  { %v724_v52 = vpop.eup %723  ;;  %v541_v62 = vmul.f32 %v722_v51, %v483_v19 }
 0x1ae   :  { %v726_v21 = vpop.eup %725  ;;  %v542_v54 = vmul.f32 %v724_v52, %v442_v24 }
 0x1af   :  { %v728_v55 = vpop.eup %727  ;;  %v544_v57 = vmul.f32 %v726_v21, %v485_v26 }
 0x1b0   :  { %v730_v58 = vpop.eup %729  ;;  %v547_v60 = vpack.c.bf16 %v542_v54, %v538_v53  ;;  %v543_v61 = vmul.f32 %v728_v55, %v444_v28 }
 0x1b1   :  { %v549_v25 = vpack.c.bf16 %v544_v57, %v540_v56  ;;  %v545_v63 = vmul.f32 %v730_v58, %v487_v29 }
 0x1b2   :  { %v548_v2 = vpack.c.bf16 %v543_v61, %v539_v59 }
 0x1b3   :  { %v550_v3 = vpack.c.bf16 %v545_v63, %v541_v62 }
 0x1b4   :  { %561 = vmatprep.subr.bf16.mxu0 %v548_v2 }
 0x1b5   :  { %602 = vmatprep.subr.bf16.mxu1 %v550_v3  ;;  %562 = vmatpush1.bf16.msra.mxu0 %v547_v60 }
 0x1b6   :  { %603 = vmatpush1.bf16.msra.mxu1 %v549_v25 }
 0x1b8   :  { %683 = vmatmul.mubr.msk.bf16.vlgmr.msra.gmra.mrb[4].mxu0 %vm557_vm11, %v546_v8 }
 0x1b9   :  { %684 = vmatmul.mubr.msk.bf16.vlgmr.msra.gmra.mrb[4].mxu1 %vm557_vm11, %v546_v8 }
 0x28b   :  { %v595_v9 = vpop.f32.mrb[4].mxu0 }
 0x28c   :  { %v636_v23 = vpop.f32.mrb[4].mxu1  ;;  %v597_v13 = vpop.f32.mrb[5].mxu0  ;;  %v596_v14 = vadd.f32 %v595_v9, %v555_v18 }
 0x28d   :  { %v638_v17 = vpop.f32.mrb[5].mxu1  ;;  %v599_v15 = vpop.f32.mrb[6].mxu0  ;;  %v598_v16 = vadd.f32 %v597_v13, %v555_v18  ;;  %v637_v11 = vadd.f32 %v636_v23, %v555_v18 }
 0x28e   :  { %v640_v6 = vpop.f32.mrb[6].mxu1  ;;  %v600_v7 = vpop.f32.mrb[7].mxu0  ;;  %v639_v10 = vadd.f32 %v638_v17, %v555_v18  ;;  %v643_v19 = vadd.f32 %v596_v14, %v778_v1 }
 0x28f   :  { %v641_v20 = vpop.f32.mrb[7].mxu1  ;;  %v644_v22 = vadd.f32 %v598_v16, %v790_v5  ;;  %v645_v24 = vadd.f32 %v773_v0, %v637_v11 }
 0x290   :  { %v646_v26 = vadd.f32 %v639_v10, %v786_v4 }
 0x291   :  { %v649_v27 = vcombine.low %v643_v19, %v644_v22 }
 0x292   :  { %v654_v28 = vcombine.low %v645_v24, %v646_v26 }
 0x293   :  { %651 = vst [vmem:[%s1011_s5] sm:$0xff] %v649_v27 }
 0x294   :  { %685 = vst [vmem:[%s1011_s5 + $0x8] sm:$0xff] %v654_v28 }

</bundles_post_ra>
